<compile_context>
chip_gen: v7x
topology: tpu7x:2x2x1
jax: 0.10.0
libtpu: 0.0.40
codegen_flags: <defaults>
</compile_context>

<pallas_src>
import jax
import jax.numpy as jnp
from jax.experimental import pallas as pl
from jax.experimental.pallas import tpu as pltpu

LANE = 128    # vreg lane width: hidden (VMEM-resident) dims padded to this
SUBLANE = 8   # vreg sublane width: batch tiles are multiples of this


def _round_up(n, m):
    return ((n + m - 1) // m) * m


def _pad2d(x, rows, cols):
    return jnp.pad(x, ((0, rows - x.shape[0]), (0, cols - x.shape[1])))


def actor_kernel(x_ref, w1_ref, b1_ref, w2_ref, b2_ref, w3_ref, b3_ref,
                 maxa_ref, o_ref):
    wdt = w1_ref.dtype  # matmul-operand dtype (f32 or bf16); accumulation is f32
    # Hidden layer 1: Linear + ReLU
    h = jnp.dot(x_ref[...].astype(wdt), w1_ref[...],
                preferred_element_type=jnp.float32)
    h = jnp.maximum(h + b1_ref[...], 0.0)
    # Hidden layer 2: Linear + ReLU
    h = jnp.dot(h.astype(wdt), w2_ref[...], preferred_element_type=jnp.float32)
    h = jnp.maximum(h + b2_ref[...], 0.0)
    # Output layer: Linear + Tanh, scaled by max_action (broadcast over batch)
    h = jnp.dot(h.astype(wdt), w3_ref[...], preferred_element_type=jnp.float32)
    o_ref[...] = maxa_ref[...] * jnp.tanh(h + b3_ref[...])


def prepare_padded_params(params, max_action, mxu_dtype=jnp.float32):
    """Pad only the VMEM-resident hidden dims to 128 lanes.

    The streamed edges (state_dim rows of w1, action_dim cols of w3, b3,
    max_action) stay un-padded so the activation path carries no padding.
    Call once (after init / each optimizer step), not per forward.
    """
    w1, b1 = params["w1"], params["b1"]
    w2, b2 = params["w2"], params["b2"]
    w3, b3 = params["w3"], params["b3"]

    state_dim = w1.shape[0]
    action_dim = w3.shape[1]
    h1_p = _round_up(w1.shape[1], LANE)
    h2_p = _round_up(w2.shape[1], LANE)

    padded = {
        "w1": _pad2d(w1, state_dim, h1_p).astype(mxu_dtype),
        "b1": _pad2d(b1.reshape(1, -1), 1, h1_p).astype(jnp.float32),
        "w2": _pad2d(w2, h1_p, h2_p).astype(mxu_dtype),
        "b2": _pad2d(b2.reshape(1, -1), 1, h2_p).astype(jnp.float32),
        "w3": _pad2d(w3, h2_p, action_dim).astype(mxu_dtype),
        "b3": b3.reshape(1, -1).astype(jnp.float32),
        "max_action": max_action.reshape(1, -1).astype(jnp.float32),
    }
    dims = {"state_dim": state_dim, "action_dim": action_dim,
            "h1_p": h1_p, "h2_p": h2_p}
    return padded, dims


def _pick_tile(B):
    # >= ~4 grid steps (keeps both v7x TensorCores busy via "parallel"
    # semantics) while capping the tile at 1024 rows; always a sublane multiple.
    return min(1024, _round_up(pl.cdiv(B, 4), SUBLANE))


def actor_forward(state, padded, dims):
    """state: (B, state_dim); padded/dims: output of prepare_padded_params."""
    B = state.shape[0]
    state_dim = dims["state_dim"]
    action_dim = dims["action_dim"]
    h1_p, h2_p = dims["h1_p"], dims["h2_p"]

    tm = _pick_tile(B)
    b_pad = _round_up(B, tm)

    x = state.astype(jnp.float32)
    if b_pad != B:  # cheap: only the (tiny) un-padded state_dim columns
        x = jnp.pad(x, ((0, b_pad - B), (0, 0)))

    grid = (b_pad // tm,)

    # Streamed blocks are batch-tiled and un-padded in the feature dim
    # (block last dim == full array dim).  Weights/biases/max_action map to
    # block (0, 0) every step -> VMEM-resident across the whole grid.
    x_spec = pl.BlockSpec((tm, state_dim), lambda i: (i, 0))
    w1_spec = pl.BlockSpec((state_dim, h1_p), lambda i: (0, 0))
    b1_spec = pl.BlockSpec((1, h1_p), lambda i: (0, 0))
    w2_spec = pl.BlockSpec((h1_p, h2_p), lambda i: (0, 0))
    b2_spec = pl.BlockSpec((1, h2_p), lambda i: (0, 0))
    w3_spec = pl.BlockSpec((h2_p, action_dim), lambda i: (0, 0))
    b3_spec = pl.BlockSpec((1, action_dim), lambda i: (0, 0))
    ma_spec = pl.BlockSpec((1, action_dim), lambda i: (0, 0))
    out_spec = pl.BlockSpec((tm, action_dim), lambda i: (i, 0))

    param_bytes = sum(int(padded[k].size) * padded[k].dtype.itemsize
                      for k in padded)
    cost = pl.CostEstimate(
        flops=2 * b_pad * (state_dim * h1_p + h1_p * h2_p + h2_p * action_dim),
        transcendentals=b_pad * action_dim,
        bytes_accessed=b_pad * (state_dim + action_dim) * 4 + param_bytes,
    )

    out = pl.pallas_call(
        actor_kernel,
        out_shape=jax.ShapeDtypeStruct((b_pad, action_dim), jnp.float32),
        grid=grid,
        in_specs=[x_spec, w1_spec, b1_spec, w2_spec, b2_spec,
                  w3_spec, b3_spec, ma_spec],
        out_specs=out_spec,
        compiler_params=pltpu.CompilerParams(
            dimension_semantics=("parallel",)),
        cost_estimate=cost,
    )(x, padded["w1"], padded["b1"], padded["w2"], padded["b2"],
      padded["w3"], padded["b3"], padded["max_action"])

    return out[:B] if b_pad != B else out


def init_params(key, state_dim, hidden_sizes, action_dim):
    """Deterministic init mimicking PyTorch nn.Linear default (uniform +/- 1/sqrt(fan_in))."""
    dims = [state_dim] + list(hidden_sizes) + [action_dim]
    params = {}
    names = ["1", "2", "3"]
    for i, (din, dout) in enumerate(zip(dims[:-1], dims[1:])):
        key, kw, kb = jax.random.split(key, 3)
        bound = 1.0 / jnp.sqrt(jnp.float32(din))
        params["w" + names[i]] = jax.random.uniform(
            kw, (din, dout), jnp.float32, minval=-bound, maxval=bound)
        params["b" + names[i]] = jax.random.uniform(
            kb, (dout,), jnp.float32, minval=-bound, maxval=bound)
    return params


def reference_forward(state, params, max_action):
    h = jnp.maximum(state @ params["w1"] + params["b1"], 0.0)
    h = jnp.maximum(h @ params["w2"] + params["b2"], 0.0)
    return max_action * jnp.tanh(h @ params["w3"] + params["b3"])


if __name__ == "__main__":
    # Shapes consistent with the module: state_dim=8, hidden_sizes=(32, 32),
    # action_dim=4, activation='ReLU', batch=2.
    state_dim, hidden_sizes, action_dim, batch = 8, (32, 32), 4, 2

    key = jax.random.PRNGKey(0)
    key, k_state = jax.random.split(key)
    params = init_params(key, state_dim, hidden_sizes, action_dim)
    state = jax.random.normal(k_state, (batch, state_dim), jnp.float32)
    max_action = jnp.full((action_dim,), 2.0, jnp.float32)  # registered buffer

    # f32 path (bit-comparable to the PyTorch reference numerics).
    padded, dims = prepare_padded_params(params, max_action)  # once, not per call
    out = jax.block_until_ready(actor_forward(state, padded, dims))
    ref = reference_forward(state, params, max_action)
    assert out.shape == (batch, action_dim)
    assert jnp.allclose(out, ref, atol=1e-5, rtol=1e-5), "mismatch vs reference"

    # Larger multi-tile batch: exercises the gridded / multi-step path
    # (>= 2 "parallel" grid steps -> both v7x TensorCores usable).
    key, k_big = jax.random.split(key)
    big_state = jax.random.normal(k_big, (300, state_dim), jnp.float32)
    big_out = jax.block_until_ready(actor_forward(big_state, padded, dims))
    big_ref = reference_forward(big_state, params, max_action)
    assert big_out.shape == (300, action_dim)
    assert jnp.allclose(big_out, big_ref, atol=1e-5, rtol=1e-5), "mismatch (big batch)"

    # bf16 MXU-operand path (the v6e/v7x-preferred configuration): weights are
    # stored bf16 once, accumulation and all elementwise math stay f32.
    padded_bf16, dims_bf16 = prepare_padded_params(
        params, max_action, mxu_dtype=jnp.bfloat16)
    bf_out = jax.block_until_ready(actor_forward(big_state, padded_bf16, dims_bf16))
    assert bf_out.shape == (300, action_dim)
    assert jnp.allclose(bf_out, big_ref, atol=5e-2, rtol=5e-2), "mismatch (bf16 path)"

    print("KERNEL_OK")
</pallas_src>

<mosaic_0001>
module attributes {stable_mosaic.version = 11 : i64} {
  func.func @actor_kernel(%arg0: i32, %arg1: memref<8x8xf32, #tpu.memory_space<vmem>>, %arg2: memref<8x128xf32, #tpu.memory_space<vmem>>, %arg3: memref<1x128xf32, #tpu.memory_space<vmem>>, %arg4: memref<128x128xf32, #tpu.memory_space<vmem>>, %arg5: memref<1x128xf32, #tpu.memory_space<vmem>>, %arg6: memref<128x4xf32, #tpu.memory_space<vmem>>, %arg7: memref<1x4xf32, #tpu.memory_space<vmem>>, %arg8: memref<1x4xf32, #tpu.memory_space<vmem>>, %arg9: memref<8x4xf32, #tpu.memory_space<vmem>>) attributes {dimension_semantics = [#tpu.dimension_semantics<parallel>], iteration_bounds = array<i64: 1>, scalar_prefetch = 0 : i64, scratch_operands = 0 : i64, tpu.core_type = #tpu.core_type<tc>, window_params = [{transform_indices = @transform_0, window_bounds = array<i64: 8, 8>}, {pipeline_mode = #tpu.pipeline_mode<synchronous>, transform_indices = @transform_1, window_bounds = array<i64: 8, 128>}, {pipeline_mode = #tpu.pipeline_mode<synchronous>, transform_indices = @transform_2, window_bounds = array<i64: 1, 128>}, {pipeline_mode = #tpu.pipeline_mode<synchronous>, transform_indices = @transform_3, window_bounds = array<i64: 128, 128>}, {pipeline_mode = #tpu.pipeline_mode<synchronous>, transform_indices = @transform_4, window_bounds = array<i64: 1, 128>}, {pipeline_mode = #tpu.pipeline_mode<synchronous>, transform_indices = @transform_5, window_bounds = array<i64: 128, 4>}, {pipeline_mode = #tpu.pipeline_mode<synchronous>, transform_indices = @transform_6, window_bounds = array<i64: 1, 4>}, {pipeline_mode = #tpu.pipeline_mode<synchronous>, transform_indices = @transform_7, window_bounds = array<i64: 1, 4>}, {transform_indices = @transform_8, window_bounds = array<i64: 8, 4>}]} {
    %c0 = arith.constant 0 : index
    %c0_0 = arith.constant 0 : index
    %0 = vector.load %arg1[%c0, %c0_0] : memref<8x8xf32, #tpu.memory_space<vmem>>, vector<8x8xf32>
    %c0_1 = arith.constant 0 : index
    %c0_2 = arith.constant 0 : index
    %1 = vector.load %arg2[%c0_1, %c0_2] : memref<8x128xf32, #tpu.memory_space<vmem>>, vector<8x128xf32>
    %cst = arith.constant dense<0.000000e+00> : vector<8x128xf32>
    %2 = tpu.matmul %0, %1, %cst {dimension_numbers = #tpu.dot_dimension_numbers<[1], [0], [0], [1], [0, 0, 1, 1], [], []>} : vector<8x8xf32>, vector<8x128xf32>, vector<8x128xf32> -> vector<8x128xf32>
    %c0_3 = arith.constant 0 : index
    %c0_4 = arith.constant 0 : index
    %3 = vector.load %arg3[%c0_3, %c0_4] : memref<1x128xf32, #tpu.memory_space<vmem>>, vector<1x128xf32>
    %4 = vector.broadcast %3 : vector<1x128xf32> to vector<8x128xf32>
    %5 = arith.addf %2, %4 : vector<8x128xf32>
    %cst_5 = arith.constant 0.000000e+00 : f32
    %6 = vector.broadcast %cst_5 : f32 to vector<8x128xf32>
    %7 = arith.maximumf %5, %6 : vector<8x128xf32>
    %c0_6 = arith.constant 0 : index
    %c0_7 = arith.constant 0 : index
    %8 = vector.load %arg4[%c0_6, %c0_7] : memref<128x128xf32, #tpu.memory_space<vmem>>, vector<128x128xf32>
    %cst_8 = arith.constant dense<0.000000e+00> : vector<8x128xf32>
    %9 = tpu.matmul %7, %8, %cst_8 {dimension_numbers = #tpu.dot_dimension_numbers<[1], [0], [0], [1], [0, 0, 1, 1], [], []>} : vector<8x128xf32>, vector<128x128xf32>, vector<8x128xf32> -> vector<8x128xf32>
    %c0_9 = arith.constant 0 : index
    %c0_10 = arith.constant 0 : index
    %10 = vector.load %arg5[%c0_9, %c0_10] : memref<1x128xf32, #tpu.memory_space<vmem>>, vector<1x128xf32>
    %11 = vector.broadcast %10 : vector<1x128xf32> to vector<8x128xf32>
    %12 = arith.addf %9, %11 : vector<8x128xf32>
    %cst_11 = arith.constant 0.000000e+00 : f32
    %13 = vector.broadcast %cst_11 : f32 to vector<8x128xf32>
    %14 = arith.maximumf %12, %13 : vector<8x128xf32>
    %c0_12 = arith.constant 0 : index
    %c0_13 = arith.constant 0 : index
    %15 = vector.load %arg6[%c0_12, %c0_13] : memref<128x4xf32, #tpu.memory_space<vmem>>, vector<128x4xf32>
    %cst_14 = arith.constant dense<0.000000e+00> : vector<8x4xf32>
    %16 = tpu.matmul %14, %15, %cst_14 {dimension_numbers = #tpu.dot_dimension_numbers<[1], [0], [0], [1], [0, 0, 1, 1], [], []>} : vector<8x128xf32>, vector<128x4xf32>, vector<8x4xf32> -> vector<8x4xf32>
    %c0_15 = arith.constant 0 : index
    %c0_16 = arith.constant 0 : index
    %17 = vector.load %arg8[%c0_15, %c0_16] : memref<1x4xf32, #tpu.memory_space<vmem>>, vector<1x4xf32>
    %c0_17 = arith.constant 0 : index
    %c0_18 = arith.constant 0 : index
    %18 = vector.load %arg7[%c0_17, %c0_18] : memref<1x4xf32, #tpu.memory_space<vmem>>, vector<1x4xf32>
    %19 = vector.broadcast %18 : vector<1x4xf32> to vector<8x4xf32>
    %20 = arith.addf %16, %19 : vector<8x4xf32>
    %21 = math.tanh %20 : vector<8x4xf32>
    %22 = vector.broadcast %17 : vector<1x4xf32> to vector<8x4xf32>
    %23 = arith.mulf %22, %21 : vector<8x4xf32>
    %c0_19 = arith.constant 0 : index
    %c0_20 = arith.constant 0 : index
    %24 = vector.load %arg9[%c0_19, %c0_20] : memref<8x4xf32, #tpu.memory_space<vmem>>, vector<8x4xf32>
    tpu.vector_store %arg9[%c0_19, %c0_20], %23 {strides = array<i32>} : memref<8x4xf32, #tpu.memory_space<vmem>>, vector<8x4xf32>,
    return
  }
  func.func @transform_0(%arg0: i32) -> (i32, i32) {
    %c0_i32 = arith.constant 0 : i32
    %c0_i32_0 = arith.constant 0 : i32
    return %arg0, %c0_i32 : i32, i32
  }
  func.func @transform_1(%arg0: i32) -> (i32, i32) {
    %c0_i32 = arith.constant 0 : i32
    %c0_i32_0 = arith.constant 0 : i32
    %c0_i32_1 = arith.constant 0 : i32
    return %c0_i32, %c0_i32_0 : i32, i32
  }
  func.func @transform_2(%arg0: i32) -> (i32, i32) {
    %c0_i32 = arith.constant 0 : i32
    %c0_i32_0 = arith.constant 0 : i32
    %c0_i32_1 = arith.constant 0 : i32
    return %c0_i32, %c0_i32_0 : i32, i32
  }
  func.func @transform_3(%arg0: i32) -> (i32, i32) {
    %c0_i32 = arith.constant 0 : i32
    %c0_i32_0 = arith.constant 0 : i32
    %c0_i32_1 = arith.constant 0 : i32
    return %c0_i32, %c0_i32_0 : i32, i32
  }
  func.func @transform_4(%arg0: i32) -> (i32, i32) {
    %c0_i32 = arith.constant 0 : i32
    %c0_i32_0 = arith.constant 0 : i32
    %c0_i32_1 = arith.constant 0 : i32
    return %c0_i32, %c0_i32_0 : i32, i32
  }
  func.func @transform_5(%arg0: i32) -> (i32, i32) {
    %c0_i32 = arith.constant 0 : i32
    %c0_i32_0 = arith.constant 0 : i32
    %c0_i32_1 = arith.constant 0 : i32
    return %c0_i32, %c0_i32_0 : i32, i32
  }
  func.func @transform_6(%arg0: i32) -> (i32, i32) {
    %c0_i32 = arith.constant 0 : i32
    %c0_i32_0 = arith.constant 0 : i32
    %c0_i32_1 = arith.constant 0 : i32
    return %c0_i32, %c0_i32_0 : i32, i32
  }
  func.func @transform_7(%arg0: i32) -> (i32, i32) {
    %c0_i32 = arith.constant 0 : i32
    %c0_i32_0 = arith.constant 0 : i32
    %c0_i32_1 = arith.constant 0 : i32
    return %c0_i32, %c0_i32_0 : i32, i32
  }
  func.func @transform_8(%arg0: i32) -> (i32, i32) {
    %c0_i32 = arith.constant 0 : i32
    %c0_i32_0 = arith.constant 0 : i32
    return %arg0, %c0_i32 : i32, i32
  }
}

</mosaic_0001>

<bundles_post_ra>
// kernel: tpu_custom_call.1
= control target key start
LH: loop header
LB: loop body
LE: loop exit
PB: predicated region body
PF: predicated region fallthrough
CT: control target
= control target key end

     0   :  { %13 = vsyncpa [#allocation3], 0  ;;  %s522_s27 = smov [#allocation2]   ;;  %s716_s0 = inlined_call_operand.vmem [shape: f32[8,8], index: 0, kind: input, shape index: {}]   ;;  %s717_s1 = inlined_call_operand.hbm [shape: f32[8,128], index: 1, kind: input, shape index: {}]   ;;  %s718_s2 = inlined_call_operand.vmem [shape: f32[1,128], index: 2, kind: input, shape index: {}]   ;;  %s719_s3 = inlined_call_operand.vmem [shape: f32[128,128], index: 3, kind: input, shape index: {}]   ;;  %s720_s4 = inlined_call_operand.vmem [shape: f32[1,128], index: 4, kind: input, shape index: {}]   ;;  %s721_s5 = inlined_call_operand.vmem [shape: f32[128,4], index: 5, kind: input, shape index: {}]   ;;  %s722_s6 = inlined_call_operand.vmem [shape: f32[1,4], index: 6, kind: input, shape index: {}]   ;;  %s723_s7 = inlined_call_operand.vmem [shape: f32[1,4], index: 7, kind: input, shape index: {}]   ;;  %s724_s8 = inlined_call_operand.vmem [shape: f32[8,4], index: 8, kind: output, shape index: {}]  }
   0x1   :  { %s22_s28 = sshll.u32 %s522_s27, 4  ;;  %s498_s9 = scalar_lea.hbm %s717_s1, 128  ;;  %s23_s28 = int_to_ptr.vmem [resolvable:$true] %s22_s28 }
   0x2   :  { %p499_p0 = scmp.ne.s32.totalorder %s717_s1, %s498_s9  ;;  %p502_p1 = scmp.lt.u32.totalorder %s498_s9, %s717_s1 }
   0x4   :  { %p504_p2 = pnand %p502_p1, %p499_p0 }
   0x6   :  { %507 = shalt.err (!%p504_p2)
}
   0x7   :  { %s508_s14 = scalar_lea.vmem %s23_s28, 128  ;;  %p513_p4 = scmp.lt.s32.totalorder %s23_s28, %s23_s28 }
   0x8   :  { %p509_p3 = scmp.ne.s32.totalorder %s23_s28, %s508_s14  ;;  %p514_p5 = scmp.lt.s32.totalorder %s508_s14, %s508_s14 }
   0xa   :  { %p515_p6 = por %p514_p5, %p513_p4 }
   0xc   :  { %p516_p7 = pnand %p515_p6, %p509_p3 }
   0xe   :  { %519 = shalt.err (!%p516_p7)
}
   0xf   :  { %25 = dma.hbm_to_vmem [thread:$0]  %s717_s1, 128, %s23_s28, [#allocation3]  }
  0x10   :  { %520 = dma.done.wait [#allocation3], 128  }
  0x11   :  { %521 = vsyncadd [#allocation3], 4294967168  ;;  %v523_v0 = vmov 0.0   ;;  %vm524_vm0 = vmmov 0   ;;  %v525_v1 = vmov 0.0|0.0   ;;  %vm50_vm1 = vcmask 64512  }
  0x12   :  { %369 = vmatprep.subr.mxu0 %v523_v0  ;;  %371 = vmatprep.mubr.msk.f32.mxu0 %vm524_vm0, %v523_v0  ;;  %v42_v2 = vld [vmem:[#allocation2] sm:$0xff]  ;;  %v126_v5 = vld [vmem:[%s719_s3 + $0x8] sm:$0xff]  ;;  %v127_v6 = vld [vmem:[%s719_s3 + $0x10] sm:$0xff]  ;;  %vm321_vm2 = vcmask 31744  }
  0x13   :  { %444 = vmatprep.subr.bf16.mxu1 %v525_v1  ;;  %406 = vmatprep.mubr.msk.f32.mxu1 %vm524_vm0, %v523_v0  ;;  %v41_v3 = vld [vmem:[%s716_s0] sm:$0xff]  ;;  %v128_v7 = vld [vmem:[%s719_s3 + $0x18] sm:$0xff]  ;;  %v130_v11 = vld [vmem:[%s719_s3 + $0x28] sm:$0xff] }
  0x14   :  { %v125_v4 = vld [vmem:[%s719_s3] sm:$0xff]  ;;  %370 = vmatpush3.msra.mxu0 %v42_v2  ;;  %v448_v9 = vpack.c.bf16 %v128_v7, %v127_v6  ;;  %v131_v13 = vld [vmem:[%s719_s3 + $0x30] sm:$0xff]  ;;  %v132_v14 = vld [vmem:[%s719_s3 + $0x38] sm:$0xff] }
  0x15   :  { %372 = vmatmul.mubr.msk.f32.vlgmr.msra.gmra.mrb[0].mxu0 %vm50_vm1, %v41_v3  ;;  %v445_v8 = vpack.c.bf16 %v126_v5, %v125_v4  ;;  %468 = vmatprep.subr.bf16.mxu0 %v525_v1  ;;  %v129_v10 = vld [vmem:[%s719_s3 + $0x20] sm:$0xff]  ;;  %v454_v15 = vpack.c.bf16 %v132_v14, %v131_v13  ;;  %v134_v17 = vld [vmem:[%s719_s3 + $0x48] sm:$0xff]  ;;  %v135_v19 = vld [vmem:[%s719_s3 + $0x50] sm:$0xff] }
  0x16   :  { %441 = vmatprep.mubr.msk.f32.mxu0 %vm524_vm0, %v523_v0  ;;  %v451_v12 = vpack.c.bf16 %v130_v11, %v129_v10  ;;  %v133_v16 = vld [vmem:[%s719_s3 + $0x40] sm:$0xff]  ;;  %v136_v20 = vld [vmem:[%s719_s3 + $0x58] sm:$0xff]  ;;  %v138_v23 = vld [vmem:[%s719_s3 + $0x68] sm:$0xff] }
  0x17   :  { %446 = vmatpush3.bf16.msra.mxu1 %v445_v8  ;;  %v457_v18 = vpack.c.bf16 %v134_v17, %v133_v16  ;;  %v460_v21 = vpack.c.bf16 %v136_v20, %v135_v19  ;;  %v137_v22 = vld [vmem:[%s719_s3 + $0x60] sm:$0xff]  ;;  %v139_v25 = vld [vmem:[%s719_s3 + $0x70] sm:$0xff]  ;;  %v140_v26 = vld [vmem:[%s719_s3 + $0x78] sm:$0xff] }
  0x18   :  { %447 = vmatprep.subr.bf16.mxu1 %v525_v1  ;;  %v463_v24 = vpack.c.bf16 %v138_v23, %v137_v22  ;;  %v466_v27 = vpack.c.bf16 %v140_v26, %v139_v25  ;;  %v219_v28 = vld [vmem:[%s721_s5] sm:$0xff]  ;;  %v220_v29 = vld [vmem:[%s721_s5 + $0x8] sm:$0xff]  ;;  %v221_v30 = vld [vmem:[%s721_s5 + $0x10] sm:$0xff] }
  0x19   :  { %v469_v31 = vpack.c.bf16 %v220_v29, %v219_v28  ;;  %v222_v32 = vld [vmem:[%s721_s5 + $0x18] sm:$0xff]  ;;  %v223_v34 = vld [vmem:[%s721_s5 + $0x20] sm:$0xff]  ;;  %v224_v35 = vld [vmem:[%s721_s5 + $0x28] sm:$0xff] }
  0x1a   :  { %v472_v33 = vpack.c.bf16 %v222_v32, %v221_v30  ;;  %v475_v36 = vpack.c.bf16 %v224_v35, %v223_v34  ;;  %v225_v37 = vld [vmem:[%s721_s5 + $0x30] sm:$0xff]  ;;  %v226_v38 = vld [vmem:[%s721_s5 + $0x38] sm:$0xff]  ;;  %v227_v40 = vld [vmem:[%s721_s5 + $0x40] sm:$0xff] }
  0x1b   :  { %449 = vmatpush3.bf16.msra.mxu1 %v448_v9  ;;  %470 = vmatpush3.bf16.msra.mxu0 %v469_v31  ;;  %v478_v39 = vpack.c.bf16 %v226_v38, %v225_v37  ;;  %v228_v41 = vld [vmem:[%s721_s5 + $0x48] sm:$0xff]  ;;  %v229_v43 = vld [vmem:[%s721_s5 + $0x50] sm:$0xff]  ;;  %v230_v44 = vld [vmem:[%s721_s5 + $0x58] sm:$0xff] }
  0x1c   :  { %450 = vmatprep.subr.bf16.mxu1 %v525_v1  ;;  %471 = vmatprep.subr.bf16.mxu0 %v525_v1  ;;  %v481_v42 = vpack.c.bf16 %v228_v41, %v227_v40  ;;  %v484_v45 = vpack.c.bf16 %v230_v44, %v229_v43  ;;  %v231_v46 = vld [vmem:[%s721_s5 + $0x60] sm:$0xff]  ;;  %v232_v47 = vld [vmem:[%s721_s5 + $0x68] sm:$0xff]  ;;  %v233_v54 = vld [vmem:[%s721_s5 + $0x70] sm:$0xff] }
  0x1d   :  { %v487_v48 = vpack.c.bf16 %v232_v47, %v231_v46  ;;  %v328_v49 = vld [vmem:[%s718_s2] ss:$0 sm:$0xff]  ;;  %v234_v55 = vld [vmem:[%s721_s5 + $0x78] sm:$0xff] }
  0x1e   :  { %v490_v56 = vpack.c.bf16 %v234_v55, %v233_v54  ;;  %v330_v57 = vld [vmem:[%s720_s4] ss:$0 sm:$0xff] }
  0x1f   :  { %452 = vmatpush3.bf16.msra.mxu1 %v451_v12  ;;  %473 = vmatpush3.bf16.msra.mxu0 %v472_v33  ;;  %v331_v62 = vld [vmem:[%s722_s6] ss:$0 sm:$0xff] }
  0x20   :  { %453 = vmatprep.subr.bf16.mxu1 %v525_v1  ;;  %474 = vmatprep.subr.bf16.mxu0 %v525_v1  ;;  %v332_v2 = vld [vmem:[%s723_s7] ss:$0 sm:$0xff] }
  0x23   :  { %455 = vmatpush3.bf16.msra.mxu1 %v454_v15  ;;  %476 = vmatpush3.bf16.msra.mxu0 %v475_v36 }
  0x24   :  { %456 = vmatprep.subr.bf16.mxu1 %v525_v1  ;;  %477 = vmatprep.subr.bf16.mxu0 %v525_v1 }
  0x27   :  { %458 = vmatpush3.bf16.msra.mxu1 %v457_v18  ;;  %479 = vmatpush3.bf16.msra.mxu0 %v478_v39 }
  0x28   :  { %459 = vmatprep.subr.bf16.mxu1 %v525_v1  ;;  %480 = vmatprep.subr.bf16.mxu0 %v525_v1 }
  0x2b   :  { %461 = vmatpush3.bf16.msra.mxu1 %v460_v21  ;;  %482 = vmatpush3.bf16.msra.mxu0 %v481_v42 }
  0x2c   :  { %462 = vmatprep.subr.bf16.mxu1 %v525_v1  ;;  %483 = vmatprep.subr.bf16.mxu0 %v525_v1 }
  0x2f   :  { %464 = vmatpush3.bf16.msra.mxu1 %v463_v24  ;;  %485 = vmatpush3.bf16.msra.mxu0 %v484_v45 }
  0x30   :  { %465 = vmatprep.subr.bf16.mxu1 %v525_v1  ;;  %486 = vmatprep.subr.bf16.mxu0 %v525_v1 }
  0x33   :  { %467 = vmatpush3.bf16.msra.mxu1 %v466_v27  ;;  %488 = vmatpush3.bf16.msra.mxu0 %v487_v48 }
  0x34   :  { %489 = vmatprep.subr.bf16.mxu0 %v525_v1 }
  0x37   :  { %491 = vmatpush3.bf16.msra.mxu0 %v490_v56 }
  0xe8   :  { %v120_v50 = vpop.f32.mrb[0].mxu0 }
  0xe9   :  { %v121_v51 = vadd.f32 %v328_v49, %v120_v50  ;;  %v373_v52 = vpop.f32.mrb[1].mxu0 }
  0xeb   :  { %v124_v53 = vmax.f32 %v121_v51, 0.0 }
  0xed   :  { %407 = vmatmul.mubr.f32.vlgmr.msra.gmra.mrb[0].mxu1 %v124_v53 }
 0x1c0   :  { %v214_v58 = vpop.f32.mrb[0].mxu1 }
 0x1c1   :  { %v215_v59 = vadd.f32 %v330_v57, %v214_v58  ;;  %v408_v60 = vpop.f32.mrb[1].mxu1 }
 0x1c3   :  { %v218_v61 = vmax.f32 %v215_v59, 0.0 }
 0x1c5   :  { %442 = vmatmul.mubr.f32.vlgmr.msra.gmra.mrb[2].mxu0 %v218_v61 }
 0x298   :  { %v309_v63 = vpop.f32.mrb[2].mxu0 }
 0x299   :  { %v310_v0 = vadd.f32 %v331_v62, %v309_v63  ;;  %v443_v1 = vpop.f32.mrb[3].mxu0 }
 0x29b   :  { %496 = vtanh.f32 %v310_v0 }
 0x2a5   :  { %v497_v3 = vpop.eup %496 }
 0x2a6   :  { %v320_v4 = vmul.f32 %v497_v3, %v332_v2 }
 0x2a8   :  { %322 = vst.msk [vmem:[%s724_s8] sm:$0xff] %vm321_vm2, %v320_v4 }
 0x2a9   :  { %327 = vsyncpa [#allocation3], 1 }

</bundles_post_ra>
